<compile_context>
chip_gen: v5e
topology: v5e:2x2
jax: 0.10.0
libtpu: 0.0.40
codegen_flags: <defaults>
</compile_context>

<pallas_src>
import functools

import jax
import jax.numpy as jnp
from jax.experimental import pallas as pl
from jax.experimental.pallas import tpu as pltpu

IN_DIM = 28 * 28   # 784
H1 = 64
H2 = 32
OUT_DIM = 10

# Lane-dense padded widths for the in-VMEM weights / in-register intermediates.
HP = 128      # both hidden layers padded to 128 lanes
OUTP = 128    # fc3 compute width (sliced to OUT_DIM before the store)


def mlp_kernel(x_ref, w1_ref, b1_ref, w2_ref, b2_ref, w3_ref, b3_ref, o_ref):
    # fc1: x is read from HBM as f32 and cast to bf16 in-register (no separate
    # XLA cast pass); MXU runs bf16 x bf16 with f32 accumulation.
    x_bf = x_ref[...].astype(jnp.bfloat16)
    h1 = jnp.dot(x_bf, w1_ref[...], preferred_element_type=jnp.float32)
    h1 = jnp.maximum(h1 + b1_ref[...], 0.0)
    # fc2 + ReLU (tiny resident f32 weights; h1/h2 stay f32 in VMEM/vregs).
    h2 = jnp.dot(h1, w2_ref[...], preferred_element_type=jnp.float32)
    h2 = jnp.maximum(h2 + b2_ref[...], 0.0)
    # fc3: compute at full 128-lane width, then store only the real 10 columns
    # straight into the (bb, 10) output block (out_shape is (B, 10)).
    o = jnp.dot(h2, w3_ref[...], preferred_element_type=jnp.float32)
    o = o + b3_ref[...]
    o_ref[...] = o[:, :OUT_DIM].astype(o_ref.dtype)


def _round_up(x, m):
    return (x + m - 1) // m * m


def _tpu_config():
    """(block_b, multi_core) from the attached TPU generation.

    v7x: 2 TensorCores/chip and very fast HBM -> big tiles, and keep >=2 grid
    steps when the batch allows so both cores get work.  v6e/v5e are single
    TensorCore -> never force a split; cap bb so the f32 x tile (double
    buffered) stays inside v5e's 16 MiB scoped-VMEM default.
    """
    try:
        kind = jax.devices()[0].device_kind.lower()
    except Exception:  # pragma: no cover - CPU/interpret fallback
        kind = ""
    if "v7" in kind:
        return 2048, True
    if "v6" in kind:
        return 1024, False
    return 1024, False  # v5e and unknown parts: conservative


def _choose_block(batch, block_b, multi_core):
    """Pick the batch-tile size (rows per grid step)."""
    b8 = _round_up(batch, 8)
    if b8 <= block_b:
        if multi_core and batch > 256:
            # Two grid steps so both v7x TensorCores get work; keep the tile a
            # multiple of 128 rows for full sublane/MXU row groups.
            return min(b8, _round_up(pl.cdiv(batch, 2), 128))
        return b8          # single tile (single-core parts: no forced split)
    return block_b


def prepare_params(params):
    """One-time weight/bias prep: pad to lane-dense widths and cast.

    Padded weight/bias lanes are exactly zero, so ReLU of padded hidden
    columns stays 0 and padded fc3 columns are 0 (they are sliced off in the
    kernel before the store).  Call this once; do NOT call per forward.
    """
    w1, b1, w2, b2, w3, b3 = params
    w1p = jnp.pad(w1.astype(jnp.float32), ((0, 0), (0, HP - H1))).astype(jnp.bfloat16)
    b1p = jnp.pad(b1.reshape(1, -1).astype(jnp.float32), ((0, 0), (0, HP - H1)))
    w2p = jnp.pad(w2.astype(jnp.float32), ((0, HP - H1), (0, HP - H2)))
    b2p = jnp.pad(b2.reshape(1, -1).astype(jnp.float32), ((0, 0), (0, HP - H2)))
    w3p = jnp.pad(w3.astype(jnp.float32), ((0, HP - H2), (0, OUTP - OUT_DIM)))
    b3p = jnp.pad(b3.reshape(1, -1).astype(jnp.float32), ((0, 0), (0, OUTP - OUT_DIM)))
    return (w1p, b1p, w2p, b2p, w3p, b3p)


@functools.partial(jax.jit, static_argnames=("block_b", "multi_core"))
def _net_forward_impl(x, prepped, block_b, multi_core):
    w1p, b1p, w2p, b2p, w3p, b3p = prepped

    # x stays f32 here; the bf16 cast happens inside the kernel (fused).
    x2d = x.reshape(-1, IN_DIM)
    if x2d.dtype not in (jnp.float32, jnp.bfloat16):
        x2d = x2d.astype(jnp.float32)
    B = x2d.shape[0]

    bb = _choose_block(B, block_b, multi_core)
    grid = (pl.cdiv(B, bb),)

    out = pl.pallas_call(
        mlp_kernel,
        out_shape=jax.ShapeDtypeStruct((B, OUT_DIM), jnp.float32),
        grid_spec=pltpu.PrefetchScalarGridSpec(
            num_scalar_prefetch=0,
            grid=grid,
            in_specs=[
                pl.BlockSpec((bb, IN_DIM), lambda i: (i, 0)),   # x tile (f32)
                pl.BlockSpec((IN_DIM, HP), lambda i: (0, 0)),   # w1 (resident, bf16)
                pl.BlockSpec((1, HP), lambda i: (0, 0)),        # b1 (f32)
                pl.BlockSpec((HP, HP), lambda i: (0, 0)),       # w2 (resident, f32)
                pl.BlockSpec((1, HP), lambda i: (0, 0)),        # b2
                pl.BlockSpec((HP, OUTP), lambda i: (0, 0)),     # w3 (resident, f32)
                pl.BlockSpec((1, OUTP), lambda i: (0, 0)),      # b3
            ],
            # Real (B, 10) output: no padded lanes in HBM, no wrapper slice.
            out_specs=pl.BlockSpec((bb, OUT_DIM), lambda i: (i, 0)),
        ),
        compiler_params=pltpu.CompilerParams(
            dimension_semantics=("parallel",),
        ),
    )(x2d, w1p, b1p, w2p, b2p, w3p, b3p)
    return out


def net_forward(x, prepped, block_b=None, multi_core=None):
    """x: any shape whose trailing dims flatten to 784 (e.g. (B, 1, 28, 28))."""
    if block_b is None or multi_core is None:
        def_bb, def_mc = _tpu_config()
        block_b = def_bb if block_b is None else block_b
        multi_core = def_mc if multi_core is None else multi_core
    return _net_forward_impl(x, prepped, block_b, multi_core)


def init_params(key):
    """Deterministic init mirroring nn.Linear shapes (stored transposed)."""
    k1, k2, k3, k4, k5, k6 = jax.random.split(key, 6)

    def linear(kw, kb, fan_in, fan_out):
        bound = 1.0 / jnp.sqrt(fan_in)
        w = jax.random.uniform(kw, (fan_in, fan_out), jnp.float32, -bound, bound)
        b = jax.random.uniform(kb, (1, fan_out), jnp.float32, -bound, bound)
        return w, b

    w1, b1 = linear(k1, k2, IN_DIM, H1)
    w2, b2 = linear(k3, k4, H1, H2)
    w3, b3 = linear(k5, k6, H2, OUT_DIM)
    return (w1, b1, w2, b2, w3, b3)


def reference_forward(x, params):
    """Pure-JAX reference mirroring the kernel's bf16 layer-1 MXU inputs."""
    w1, b1, w2, b2, w3, b3 = params
    x2d = x.reshape(-1, IN_DIM).astype(jnp.bfloat16).astype(jnp.float32)
    w1f = w1.astype(jnp.bfloat16).astype(jnp.float32)
    h1 = jnp.maximum(x2d @ w1f + b1, 0.0)
    h2 = jnp.maximum(h1 @ w2 + b2, 0.0)
    return h2 @ w3 + b3


if __name__ == "__main__":
    key = jax.random.PRNGKey(0)
    kp, kx, kx2 = jax.random.split(key, 3)
    params = init_params(kp)
    prepped = prepare_params(params)          # one-time weight prep

    # Small MNIST-like batch: (B, 1, 28, 28) NCHW, flattened by the net.
    x = jax.random.normal(kx, (8, 1, 28, 28), jnp.float32)
    out = net_forward(x, prepped)
    jax.block_until_ready(out)
    ref = reference_forward(x, params)
    assert out.shape == (8, OUT_DIM), out.shape
    assert jnp.allclose(out, ref, atol=2e-2, rtol=2e-2), "mismatch vs reference (B=8)"

    # Multi-step grid with a partial (masked) last tile: B=200, bb=64 -> 4 steps.
    x2 = jax.random.normal(kx2, (200, 1, 28, 28), jnp.float32)
    out2 = net_forward(x2, prepped, block_b=64, multi_core=False)
    jax.block_until_ready(out2)
    ref2 = reference_forward(x2, params)
    assert out2.shape == (200, OUT_DIM), out2.shape
    assert jnp.allclose(out2, ref2, atol=2e-2, rtol=2e-2), "mismatch vs reference (B=200)"

    print("KERNEL_OK")
</pallas_src>

<mosaic_0001>
module attributes {stable_mosaic.version = 11 : i64} {
  func.func @mlp_kernel(%arg0: i32, %arg1: memref<8x784xf32, #tpu.memory_space<vmem>>, %arg2: memref<784x128xbf16, #tpu.memory_space<vmem>>, %arg3: memref<1x128xf32, #tpu.memory_space<vmem>>, %arg4: memref<128x128xf32, #tpu.memory_space<vmem>>, %arg5: memref<1x128xf32, #tpu.memory_space<vmem>>, %arg6: memref<128x128xf32, #tpu.memory_space<vmem>>, %arg7: memref<1x128xf32, #tpu.memory_space<vmem>>, %arg8: memref<8x10xf32, #tpu.memory_space<vmem>>) attributes {dimension_semantics = [#tpu.dimension_semantics<parallel>], iteration_bounds = array<i64: 1>, scalar_prefetch = 0 : i64, scratch_operands = 0 : i64, tpu.core_type = #tpu.core_type<tc>, window_params = [{transform_indices = @transform_0, window_bounds = array<i64: 8, 784>}, {pipeline_mode = #tpu.pipeline_mode<synchronous>, transform_indices = @transform_1, window_bounds = array<i64: 784, 128>}, {pipeline_mode = #tpu.pipeline_mode<synchronous>, transform_indices = @transform_2, window_bounds = array<i64: 1, 128>}, {pipeline_mode = #tpu.pipeline_mode<synchronous>, transform_indices = @transform_3, window_bounds = array<i64: 128, 128>}, {pipeline_mode = #tpu.pipeline_mode<synchronous>, transform_indices = @transform_4, window_bounds = array<i64: 1, 128>}, {pipeline_mode = #tpu.pipeline_mode<synchronous>, transform_indices = @transform_5, window_bounds = array<i64: 128, 128>}, {pipeline_mode = #tpu.pipeline_mode<synchronous>, transform_indices = @transform_6, window_bounds = array<i64: 1, 128>}, {transform_indices = @transform_7, window_bounds = array<i64: 8, 10>}]} {
    %c0 = arith.constant 0 : index
    %c0_0 = arith.constant 0 : index
    %0 = vector.load %arg1[%c0, %c0_0] : memref<8x784xf32, #tpu.memory_space<vmem>>, vector<8x784xf32>
    %1 = arith.truncf %0 : vector<8x784xf32> to vector<8x784xbf16>
    %c0_1 = arith.constant 0 : index
    %c0_2 = arith.constant 0 : index
    %2 = vector.load %arg2[%c0_1, %c0_2] : memref<784x128xbf16, #tpu.memory_space<vmem>>, vector<784x128xbf16>
    %cst = arith.constant dense<0.000000e+00> : vector<8x128xf32>
    %3 = tpu.matmul %1, %2, %cst {dimension_numbers = #tpu.dot_dimension_numbers<[1], [0], [0], [1], [0, 0, 1, 1], [], []>} : vector<8x784xbf16>, vector<784x128xbf16>, vector<8x128xf32> -> vector<8x128xf32>
    %c0_3 = arith.constant 0 : index
    %c0_4 = arith.constant 0 : index
    %4 = vector.load %arg3[%c0_3, %c0_4] : memref<1x128xf32, #tpu.memory_space<vmem>>, vector<1x128xf32>
    %5 = vector.broadcast %4 : vector<1x128xf32> to vector<8x128xf32>
    %6 = arith.addf %3, %5 : vector<8x128xf32>
    %cst_5 = arith.constant 0.000000e+00 : f32
    %7 = vector.broadcast %cst_5 : f32 to vector<8x128xf32>
    %8 = arith.maximumf %6, %7 : vector<8x128xf32>
    %c0_6 = arith.constant 0 : index
    %c0_7 = arith.constant 0 : index
    %9 = vector.load %arg4[%c0_6, %c0_7] : memref<128x128xf32, #tpu.memory_space<vmem>>, vector<128x128xf32>
    %cst_8 = arith.constant dense<0.000000e+00> : vector<8x128xf32>
    %10 = tpu.matmul %8, %9, %cst_8 {dimension_numbers = #tpu.dot_dimension_numbers<[1], [0], [0], [1], [0, 0, 1, 1], [], []>} : vector<8x128xf32>, vector<128x128xf32>, vector<8x128xf32> -> vector<8x128xf32>
    %c0_9 = arith.constant 0 : index
    %c0_10 = arith.constant 0 : index
    %11 = vector.load %arg5[%c0_9, %c0_10] : memref<1x128xf32, #tpu.memory_space<vmem>>, vector<1x128xf32>
    %12 = vector.broadcast %11 : vector<1x128xf32> to vector<8x128xf32>
    %13 = arith.addf %10, %12 : vector<8x128xf32>
    %cst_11 = arith.constant 0.000000e+00 : f32
    %14 = vector.broadcast %cst_11 : f32 to vector<8x128xf32>
    %15 = arith.maximumf %13, %14 : vector<8x128xf32>
    %c0_12 = arith.constant 0 : index
    %c0_13 = arith.constant 0 : index
    %16 = vector.load %arg6[%c0_12, %c0_13] : memref<128x128xf32, #tpu.memory_space<vmem>>, vector<128x128xf32>
    %cst_14 = arith.constant dense<0.000000e+00> : vector<8x128xf32>
    %17 = tpu.matmul %15, %16, %cst_14 {dimension_numbers = #tpu.dot_dimension_numbers<[1], [0], [0], [1], [0, 0, 1, 1], [], []>} : vector<8x128xf32>, vector<128x128xf32>, vector<8x128xf32> -> vector<8x128xf32>
    %c0_15 = arith.constant 0 : index
    %c0_16 = arith.constant 0 : index
    %18 = vector.load %arg7[%c0_15, %c0_16] : memref<1x128xf32, #tpu.memory_space<vmem>>, vector<1x128xf32>
    %19 = vector.broadcast %18 : vector<1x128xf32> to vector<8x128xf32>
    %20 = arith.addf %17, %19 : vector<8x128xf32>
    %21 = vector.extract_strided_slice %20 {offsets = [0, 0], sizes = [8, 10], strides = [1, 1]} : vector<8x128xf32> to vector<8x10xf32>
    %c0_17 = arith.constant 0 : index
    %c0_18 = arith.constant 0 : index
    %22 = vector.load %arg8[%c0_17, %c0_18] : memref<8x10xf32, #tpu.memory_space<vmem>>, vector<8x10xf32>
    tpu.vector_store %arg8[%c0_17, %c0_18], %21 {strides = array<i32>} : memref<8x10xf32, #tpu.memory_space<vmem>>, vector<8x10xf32>,
    return
  }
  func.func @transform_0(%arg0: i32) -> (i32, i32) {
    %c0_i32 = arith.constant 0 : i32
    %c0_i32_0 = arith.constant 0 : i32
    return %arg0, %c0_i32 : i32, i32
  }
  func.func @transform_1(%arg0: i32) -> (i32, i32) {
    %c0_i32 = arith.constant 0 : i32
    %c0_i32_0 = arith.constant 0 : i32
    %c0_i32_1 = arith.constant 0 : i32
    return %c0_i32, %c0_i32_0 : i32, i32
  }
  func.func @transform_2(%arg0: i32) -> (i32, i32) {
    %c0_i32 = arith.constant 0 : i32
    %c0_i32_0 = arith.constant 0 : i32
    %c0_i32_1 = arith.constant 0 : i32
    return %c0_i32, %c0_i32_0 : i32, i32
  }
  func.func @transform_3(%arg0: i32) -> (i32, i32) {
    %c0_i32 = arith.constant 0 : i32
    %c0_i32_0 = arith.constant 0 : i32
    %c0_i32_1 = arith.constant 0 : i32
    return %c0_i32, %c0_i32_0 : i32, i32
  }
  func.func @transform_4(%arg0: i32) -> (i32, i32) {
    %c0_i32 = arith.constant 0 : i32
    %c0_i32_0 = arith.constant 0 : i32
    %c0_i32_1 = arith.constant 0 : i32
    return %c0_i32, %c0_i32_0 : i32, i32
  }
  func.func @transform_5(%arg0: i32) -> (i32, i32) {
    %c0_i32 = arith.constant 0 : i32
    %c0_i32_0 = arith.constant 0 : i32
    %c0_i32_1 = arith.constant 0 : i32
    return %c0_i32, %c0_i32_0 : i32, i32
  }
  func.func @transform_6(%arg0: i32) -> (i32, i32) {
    %c0_i32 = arith.constant 0 : i32
    %c0_i32_0 = arith.constant 0 : i32
    %c0_i32_1 = arith.constant 0 : i32
    return %c0_i32, %c0_i32_0 : i32, i32
  }
  func.func @transform_7(%arg0: i32) -> (i32, i32) {
    %c0_i32 = arith.constant 0 : i32
    %c0_i32_0 = arith.constant 0 : i32
    return %arg0, %c0_i32 : i32, i32
  }
}

</mosaic_0001>

<bundles_post_ra>
// kernel: _net_forward_impl.1
= control target key start
LH: loop header
LB: loop body
LE: loop exit
PB: predicated region body
PF: predicated region fallthrough
CT: control target
= control target key end

     0   :  { %s1226_s0 = inlined_call_operand.vmem [shape: f32[8,784], index: 0, kind: input, shape index: {}]   ;;  %s1227_s1 = inlined_call_operand.vmem [shape: bf16[784,128], index: 1, kind: input, shape index: {}]   ;;  %s1228_s2 = inlined_call_operand.vmem [shape: f32[1,128], index: 2, kind: input, shape index: {}]   ;;  %s1229_s3 = inlined_call_operand.vmem [shape: f32[128,128], index: 3, kind: input, shape index: {}]   ;;  %s1230_s4 = inlined_call_operand.vmem [shape: f32[1,128], index: 4, kind: input, shape index: {}]   ;;  %s1231_s5 = inlined_call_operand.vmem [shape: f32[128,128], index: 5, kind: input, shape index: {}]   ;;  %s1232_s6 = inlined_call_operand.vmem [shape: f32[1,128], index: 6, kind: input, shape index: {}]   ;;  %s1233_s7 = inlined_call_operand.hbm [shape: f32[8,10], index: 7, kind: output, shape index: {}]  }
   0x1   :  { %v837_v0 = vld [vmem:[%s1227_s1 + $0x38] sm:$0xff]  ;;  %v836_v3 = vld [vmem:[%s1227_s1 + $0x30] sm:$0xff]  ;;  %v835_v8 = vld [vmem:[%s1227_s1 + $0x28] sm:$0xff] }
   0x2   :  { %v845_v1 = vld [vmem:[%s1227_s1 + $0x78] sm:$0xff]  ;;  %442 = vmatpush.bf16.msra.mxu0 %v837_v0  ;;  %v844_v4 = vld [vmem:[%s1227_s1 + $0x70] sm:$0xff]  ;;  %v843_v9 = vld [vmem:[%s1227_s1 + $0x68] sm:$0xff] }
   0x3   :  { %v853_v2 = vld [vmem:[%s1227_s1 + $0xb8] sm:$0xff]  ;;  %455 = vmatpush.bf16.msra.mxu1 %v845_v1  ;;  %v852_v5 = vld [vmem:[%s1227_s1 + $0xb0] sm:$0xff]  ;;  %v851_v10 = vld [vmem:[%s1227_s1 + $0xa8] sm:$0xff] }
   0x4   :  { %468 = vmatpush.bf16.msra.mxu2 %v853_v2  ;;  %v861_v6 = vld [vmem:[%s1227_s1 + $0xf8] sm:$0xff]  ;;  %v860_v7 = vld [vmem:[%s1227_s1 + $0xf0] sm:$0xff]  ;;  %v859_v11 = vld [vmem:[%s1227_s1 + $0xe8] sm:$0xff] }
   0x5   :  { %481 = vmatpush.bf16.msra.mxu3 %v861_v6  ;;  %v834_v12 = vld [vmem:[%s1227_s1 + $0x20] sm:$0xff]  ;;  %v833_v16 = vld [vmem:[%s1227_s1 + $0x18] sm:$0xff] }
   0x6   :  { %443 = vmatpush.bf16.msra.mxu0 %v836_v3  ;;  %v842_v13 = vld [vmem:[%s1227_s1 + $0x60] sm:$0xff]  ;;  %v841_v17 = vld [vmem:[%s1227_s1 + $0x58] sm:$0xff] }
   0x7   :  { %456 = vmatpush.bf16.msra.mxu1 %v844_v4  ;;  %v850_v14 = vld [vmem:[%s1227_s1 + $0xa0] sm:$0xff]  ;;  %v849_v18 = vld [vmem:[%s1227_s1 + $0x98] sm:$0xff] }
   0x8   :  { %469 = vmatpush.bf16.msra.mxu2 %v852_v5  ;;  %v858_v15 = vld [vmem:[%s1227_s1 + $0xe0] sm:$0xff]  ;;  %v857_v19 = vld [vmem:[%s1227_s1 + $0xd8] sm:$0xff] }
   0x9   :  { %482 = vmatpush.bf16.msra.mxu3 %v860_v7 }
   0xa   :  { %444 = vmatpush.bf16.msra.mxu0 %v835_v8 }
   0xb   :  { %457 = vmatpush.bf16.msra.mxu1 %v843_v9 }
   0xc   :  { %470 = vmatpush.bf16.msra.mxu2 %v851_v10 }
   0xd   :  { %483 = vmatpush.bf16.msra.mxu3 %v859_v11 }
   0xe   :  { %445 = vmatpush.bf16.msra.mxu0 %v834_v12 }
   0xf   :  { %458 = vmatpush.bf16.msra.mxu1 %v842_v13 }
  0x10   :  { %471 = vmatpush.bf16.msra.mxu2 %v850_v14 }
  0x11   :  { %484 = vmatpush.bf16.msra.mxu3 %v858_v15 }
  0x12   :  { %12 = vsyncpa [#allocation3], 0  ;;  %446 = vmatpush.bf16.msra.mxu0 %v833_v16  ;;  %v832_v20 = vld [vmem:[%s1227_s1 + $0x10] sm:$0xff]  ;;  %v831_v24 = vld [vmem:[%s1227_s1 + $0x8] sm:$0xff]  ;;  %vm438_vm0 = vcmask 130048   ;;  %s909_s13 = smov [#allocation2]  }
  0x13   :  { %459 = vmatpush.bf16.msra.mxu1 %v841_v17  ;;  %v840_v21 = vld [vmem:[%s1227_s1 + $0x50] sm:$0xff]  ;;  %v839_v25 = vld [vmem:[%s1227_s1 + $0x48] sm:$0xff]  ;;  %v830_v27 = vld [vmem:[%s1227_s1] sm:$0xff]  ;;  %s622_s14 = sshll.u32 %s909_s13, 4  ;;  %s624_s17 = sshll.u32 %s1233_s7, 4  ;;  %vm615_vm1 = vcmask 80896   ;;  %s623_s14 = int_to_ptr.vmem [resolvable:$true] %s622_s14  ;;  %s625_s17 = int_to_ptr.hbm [resolvable:$true] %s624_s17 }
  0x14   :  { %472 = vmatpush.bf16.msra.mxu2 %v849_v18  ;;  %v848_v22 = vld [vmem:[%s1227_s1 + $0x90] sm:$0xff]  ;;  %v847_v26 = vld [vmem:[%s1227_s1 + $0x88] sm:$0xff]  ;;  %v838_v29 = vld [vmem:[%s1227_s1 + $0x40] sm:$0xff] }
  0x15   :  { %485 = vmatpush.bf16.msra.mxu3 %v857_v19  ;;  %v856_v23 = vld [vmem:[%s1227_s1 + $0xd0] sm:$0xff]  ;;  %v855_v28 = vld [vmem:[%s1227_s1 + $0xc8] sm:$0xff]  ;;  %v28_v30 = vld [vmem:[%s1226_s0] sm:$0xff] }
  0x16   :  { %447 = vmatpush.bf16.msra.mxu0 %v832_v20  ;;  %v29_v31 = vld [vmem:[%s1226_s0 + $0x8] sm:$0xff]  ;;  %v869_v32 = vld [vmem:[%s1227_s1 + $0x138] sm:$0xff]  ;;  %v846_v34 = vld [vmem:[%s1227_s1 + $0x80] sm:$0xff]  ;;  %v35_v36 = vpack.c.bf16 %v28_v30, %v28_v30 }
  0x17   :  { %460 = vmatpush.bf16.msra.mxu1 %v840_v21  ;;  %v877_v33 = vld [vmem:[%s1227_s1 + $0x178] sm:$0xff]  ;;  %v30_v35 = vld [vmem:[%s1226_s0 + $0x10] sm:$0xff]  ;;  %v36_v37 = vpack.c.bf16 %v29_v31, %v29_v31  ;;  %v854_v38 = vld [vmem:[%s1227_s1 + $0xc0] sm:$0xff] }
  0x18   :  { %473 = vmatpush.bf16.msra.mxu2 %v848_v22  ;;  %v878_v39 = vld [vmem:[%s1227_s1 + $0x180] sm:$0xff]  ;;  %v31_v40 = vld [vmem:[%s1226_s0 + $0x18] sm:$0xff]  ;;  %v868_v41 = vld [vmem:[%s1227_s1 + $0x130] sm:$0xff]  ;;  %v37_v43 = vpack.c.bf16 %v30_v35, %v30_v35 }
  0x19   :  { %486 = vmatpush.bf16.msra.mxu3 %v856_v23  ;;  %v876_v42 = vld [vmem:[%s1227_s1 + $0x170] sm:$0xff]  ;;  %v38_v44 = vpack.c.bf16 %v31_v40, %v31_v40  ;;  %v867_v45 = vld [vmem:[%s1227_s1 + $0x128] sm:$0xff]  ;;  %v866_v47 = vld [vmem:[%s1227_s1 + $0x120] sm:$0xff] }
  0x1a   :  { %448 = vmatpush.bf16.msra.mxu0 %v831_v24  ;;  %v875_v46 = vld [vmem:[%s1227_s1 + $0x168] sm:$0xff]  ;;  %v874_v48 = vld [vmem:[%s1227_s1 + $0x160] sm:$0xff]  ;;  %v865_v49 = vld [vmem:[%s1227_s1 + $0x118] sm:$0xff] }
  0x1b   :  { %461 = vmatpush.bf16.msra.mxu1 %v839_v25  ;;  %v873_v50 = vld [vmem:[%s1227_s1 + $0x158] sm:$0xff]  ;;  %v34_v51 = vld [vmem:[%s1226_s0 + $0x30] sm:$0xff]  ;;  %v863_v55 = vld [vmem:[%s1227_s1 + $0x108] sm:$0xff] }
  0x1c   :  { %474 = vmatpush.bf16.msra.mxu2 %v847_v26  ;;  %v864_v52 = vld [vmem:[%s1227_s1 + $0x110] sm:$0xff]  ;;  %v41_v54 = vpack.c.bf16 %v34_v51, %v34_v51  ;;  %v871_v56 = vld [vmem:[%s1227_s1 + $0x148] sm:$0xff]  ;;  %v862_v57 = vld [vmem:[%s1227_s1 + $0x100] sm:$0xff] }
  0x1d   :  { %487 = vmatpush.bf16.msra.mxu3 %v855_v28  ;;  %v872_v53 = vld [vmem:[%s1227_s1 + $0x150] sm:$0xff]  ;;  %v870_v58 = vld [vmem:[%s1227_s1 + $0x140] sm:$0xff]  ;;  %v33_v60 = vld [vmem:[%s1226_s0 + $0x28] sm:$0xff] }
  0x1e   :  { %449 = vmatpush.bf16.msra.mxu0 %v830_v27  ;;  %v32_v59 = vld [vmem:[%s1226_s0 + $0x20] sm:$0xff]  ;;  %v40_v62 = vpack.c.bf16 %v33_v60, %v33_v60  ;;  %v549_v63 = vld [vmem:[%s1229_s3 + $0x78] sm:$0xff]  ;;  %v548_v0 = vld [vmem:[%s1229_s3 + $0x70] sm:$0xff] }
  0x1f   :  { %462 = vmatpush.bf16.msra.mxu1 %v838_v29  ;;  %v39_v61 = vpack.c.bf16 %v32_v59, %v32_v59  ;;  %v547_v1 = vld [vmem:[%s1229_s3 + $0x68] sm:$0xff]  ;;  %v546_v2 = vld [vmem:[%s1229_s3 + $0x60] sm:$0xff]  ;;  %v545_v3 = vld [vmem:[%s1229_s3 + $0x58] sm:$0xff] }
  0x20   :  { %475 = vmatpush.bf16.msra.mxu2 %v846_v34  ;;  %v544_v4 = vld [vmem:[%s1229_s3 + $0x50] sm:$0xff]  ;;  %v543_v5 = vld [vmem:[%s1229_s3 + $0x48] sm:$0xff]  ;;  %v542_v6 = vld [vmem:[%s1229_s3 + $0x40] sm:$0xff] }
  0x21   :  { %450 = vmatmul.bf16.vlgmr.msra.gmra.mxu0 %v35_v36  ;;  %488 = vmatpush.bf16.msra.mxu3 %v854_v38  ;;  %v541_v7 = vld [vmem:[%s1229_s3 + $0x38] sm:$0xff]  ;;  %v540_v8 = vld [vmem:[%s1229_s3 + $0x30] sm:$0xff]  ;;  %v539_v9 = vld [vmem:[%s1229_s3 + $0x28] sm:$0xff] }
  0x22   :  { %494 = vmatpush.bf16.msrb.mxu0 %v869_v32  ;;  %463 = vmatmul.bf16.vlgmr.msra.gmra.mxu1 %v36_v37  ;;  %v538_v10 = vld [vmem:[%s1229_s3 + $0x20] sm:$0xff]  ;;  %v537_v11 = vld [vmem:[%s1229_s3 + $0x18] sm:$0xff]  ;;  %v536_v14 = vld [vmem:[%s1229_s3 + $0x10] sm:$0xff] }
  0x23   :  { %507 = vmatpush.bf16.msrb.mxu1 %v877_v33  ;;  %476 = vmatmul.bf16.vlgmr.msra.gmra.mxu2 %v37_v43  ;;  %v535_v15 = vld [vmem:[%s1229_s3 + $0x8] sm:$0xff]  ;;  %v534_v16 = vld [vmem:[%s1229_s3] sm:$0xff]  ;;  %v590_v17 = vld [vmem:[%s1231_s5 + $0x78] sm:$0xff] }
  0x24   :  { %527 = vmatpush.bf16.msrb.mxu2 %v878_v39  ;;  %489 = vmatmul.bf16.vlgmr.msra.gmra.mxu3 %v38_v44  ;;  %v589_v18 = vld [vmem:[%s1231_s5 + $0x70] sm:$0xff]  ;;  %v588_v21 = vld [vmem:[%s1231_s5 + $0x68] sm:$0xff]  ;;  %v587_v24 = vld [vmem:[%s1231_s5 + $0x60] sm:$0xff] }
  0x25   :  { %554 = vmatpush.msrb.mxu3 %v549_v63  ;;  %v880_v25 = vld [vmem:[%s1228_s2] ss:$0 sm:$0xff]  ;;  %v586_v26 = vld [vmem:[%s1231_s5 + $0x58] sm:$0xff]  ;;  %v585_v27 = vld [vmem:[%s1231_s5 + $0x50] sm:$0xff] }
  0x26   :  { %495 = vmatpush.bf16.msrb.mxu0 %v868_v41  ;;  %v584_v29 = vld [vmem:[%s1231_s5 + $0x48] sm:$0xff]  ;;  %v583_v32 = vld [vmem:[%s1231_s5 + $0x40] sm:$0xff]  ;;  %v582_v34 = vld [vmem:[%s1231_s5 + $0x38] sm:$0xff] }
  0x27   :  { %508 = vmatpush.bf16.msrb.mxu1 %v876_v42  ;;  %555 = vmatpush.msrb.mxu3 %v548_v0  ;;  %v581_v35 = vld [vmem:[%s1231_s5 + $0x30] sm:$0xff]  ;;  %v580_v37 = vld [vmem:[%s1231_s5 + $0x28] sm:$0xff]  ;;  %v579_v39 = vld [vmem:[%s1231_s5 + $0x20] sm:$0xff] }
  0x28   :  { %595 = vmatpush.msra.mxu2 %v590_v17  ;;  %v578_v41 = vld [vmem:[%s1231_s5 + $0x18] sm:$0xff]  ;;  %v577_v51 = vld [vmem:[%s1231_s5 + $0x10] sm:$0xff] }
  0x29   :  { %556 = vmatpush.msrb.mxu3 %v547_v1 }
  0x2a   :  { %496 = vmatpush.bf16.msrb.mxu0 %v867_v45  ;;  %596 = vmatpush.msra.mxu2 %v589_v18 }
  0x2b   :  { %509 = vmatpush.bf16.msrb.mxu1 %v875_v46  ;;  %557 = vmatpush.msrb.mxu3 %v546_v2 }
  0x2c   :  { %597 = vmatpush.msra.mxu2 %v588_v21 }
  0x2d   :  { %558 = vmatpush.msrb.mxu3 %v545_v3 }
  0x2e   :  { %497 = vmatpush.bf16.msrb.mxu0 %v866_v47  ;;  %598 = vmatpush.msra.mxu2 %v587_v24 }
  0x2f   :  { %510 = vmatpush.bf16.msrb.mxu1 %v874_v48  ;;  %559 = vmatpush.msrb.mxu3 %v544_v4 }
  0x30   :  { %599 = vmatpush.msra.mxu2 %v586_v26 }
  0x31   :  { %560 = vmatpush.msrb.mxu3 %v543_v5 }
  0x32   :  { %498 = vmatpush.bf16.msrb.mxu0 %v865_v49  ;;  %600 = vmatpush.msra.mxu2 %v585_v27 }
  0x33   :  { %511 = vmatpush.bf16.msrb.mxu1 %v873_v50  ;;  %829 = vmatmul.msk.bf16.vlgmr.msrb.gmra.mxu2 %vm438_vm0, %v41_v54  ;;  %v881_v54 = vld [vmem:[%s1230_s4] ss:$0 sm:$0xff] }
  0x34   :  { %561 = vmatpush.msrb.mxu3 %v542_v6  ;;  %601 = vmatpush.msra.mxu2 %v584_v29 }
  0x36   :  { %499 = vmatpush.bf16.msrb.mxu0 %v864_v52  ;;  %562 = vmatpush.msrb.mxu3 %v541_v7  ;;  %v576_v52 = vld [vmem:[%s1231_s5 + $0x8] sm:$0xff] }
  0x37   :  { %512 = vmatpush.bf16.msrb.mxu1 %v872_v53  ;;  %602 = vmatpush.msra.mxu2 %v583_v32  ;;  %v575_v53 = vld [vmem:[%s1231_s5] sm:$0xff] }
  0x38   :  { %563 = vmatpush.msrb.mxu3 %v540_v8 }
  0x39   :  { %603 = vmatpush.msra.mxu2 %v582_v34 }
  0x3a   :  { %500 = vmatpush.bf16.msrb.mxu0 %v863_v55  ;;  %564 = vmatpush.msrb.mxu3 %v539_v9 }
  0x3b   :  { %513 = vmatpush.bf16.msrb.mxu1 %v871_v56  ;;  %604 = vmatpush.msra.mxu2 %v581_v35 }
  0x3c   :  { %565 = vmatpush.msrb.mxu3 %v538_v10 }
  0x3d   :  { %605 = vmatpush.msra.mxu2 %v580_v37 }
  0x3e   :  { %501 = vmatpush.bf16.msrb.mxu0 %v862_v57  ;;  %566 = vmatpush.msrb.mxu3 %v537_v11 }
  0x3f   :  { %514 = vmatpush.bf16.msrb.mxu1 %v870_v58  ;;  %606 = vmatpush.msra.mxu2 %v579_v39  ;;  %v882_v58 = vld [vmem:[%s1232_s6] ss:$0 sm:$0xff] }
  0x40   :  { %567 = vmatpush.msrb.mxu3 %v536_v14 }
  0x41   :  { %502 = vmatmul.bf16.vlgmr.msrb.gmra.mxu0 %v39_v61  ;;  %607 = vmatpush.msra.mxu2 %v578_v41 }
  0x42   :  { %515 = vmatmul.bf16.vlgmr.msrb.gmra.mxu1 %v40_v62  ;;  %568 = vmatpush.msrb.mxu3 %v535_v15 }
  0x43   :  { %608 = vmatpush.msra.mxu2 %v577_v51 }
  0x44   :  { %569 = vmatpush.msrb.mxu3 %v534_v16 }
  0x45   :  { %609 = vmatpush.msra.mxu2 %v576_v52 }
  0x47   :  { %610 = vmatpush.msra.mxu2 %v575_v53 }
  0x9e   :  { %v451_v12 = vpop.f32.mrf.mxu0 }
  0x9f   :  { %v464_v13 = vpop.f32.mrf.mxu1  ;;  %v452_v28 = vadd.f32 %v880_v25, %v451_v12 }
  0xa1   :  { %v465_v33 = vadd.f32 %v464_v13, %v452_v28 }
  0xa6   :  { %v453_v19 = vpop.f32.mrf.mxu0  ;;  %v477_v22 = vpop.f32.mrf.mxu2 }
  0xa7   :  { %v466_v20 = vpop.f32.mrf.mxu1  ;;  %v490_v23 = vpop.f32.mrf.mxu3  ;;  %v478_v36 = vadd.f32 %v477_v22, %v465_v33 }
  0xa9   :  { %v491_v40 = vadd.f32 %v490_v23, %v478_v36 }
  0xae   :  { %v479_v30 = vpop.f32.mrf.mxu2 }
  0xaf   :  { %v492_v31 = vpop.f32.mrf.mxu3 }
  0xb6   :  { %v529_v38 = vpop.f32.mrf.mxu2 }
  0xbe   :  { %v503_v42 = vpop.f32.mrf.mxu0  ;;  %v531_v46 = vpop.f32.mrf.mxu2 }
  0xbf   :  { %v516_v43 = vpop.f32.mrf.mxu1  ;;  %v504_v44 = vadd.f32 %v503_v42, %v491_v40 }
  0xc1   :  { %v517_v45 = vadd.f32 %v516_v43, %v504_v44 }
  0xc3   :  { %v530_v47 = vadd.f32 %v529_v38, %v517_v45 }
  0xc5   :  { %v533_v48 = vmax.f32 %v530_v47, 0.0 }
  0xc6   :  { %v505_v49 = vpop.f32.mrf.mxu0 }
  0xc7   :  { %v518_v50 = vpop.f32.mrf.mxu1  ;;  %570 = vmatmul.f32.vlgmr.msrb.gmra.mxu3 %v533_v48 }
 0x14a   :  { %v571_v55 = vpop.f32.mrf.mxu3 }
 0x14b   :  { %v572_v56 = vadd.f32 %v881_v54, %v571_v55 }
 0x14d   :  { %v574_v57 = vmax.f32 %v572_v56, 0.0 }
 0x14f   :  { %611 = vmatmul.f32.vlgmr.msra.gmra.mxu2 %v574_v57 }
 0x1d2   :  { %v612_v59 = vpop.f32.mrf.mxu2 }
 0x1d3   :  { %v613_v60 = vadd.f32 %v882_v58, %v612_v59 }
 0x1d5   :  { %616 = vst.msk [vmem:[#allocation2] sm:$0xff] %vm615_vm1, %v613_v60 }
 0x1d6   :  { %627 = dma.vmem_to_hbm [thread:$0]  %s623_s14, 128, %s625_s17, [#allocation3]  }
 0x1d7   :  { %907 = dma.done.wait [#allocation3], 128  }
 0x1d8   :  { %908 = vsyncadd [#allocation3], 4294967168 }
 0x1d9   :  { %632 = vsyncpa [#allocation3], 1 }

</bundles_post_ra>
